<compile_context>
chip_gen: v7x
topology: tpu7x:2x2x1
jax: 0.10.0
libtpu: 0.0.40
codegen_flags: <defaults>
</compile_context>

<pallas_src>
import jax
import jax.numpy as jnp
from jax.experimental import pallas as pl
from jax.experimental.pallas import tpu as pltpu

NEG_SLOPE = 0.01  # torch.nn.LeakyReLU() default negative_slope


def combine_kernel(x_ref, m_ref, o_ref):
    # x_ref: (TR, TL) current tile   m_ref: (TR, 2) per-row (scale, shift)
    m1 = m_ref[:, 0:1]                     # (TR, 1) -> broadcast over lanes
    m2 = m_ref[:, 1:2]
    y = x_ref[...] * m1 + m2
    # leaky_relu: max(y, slope*y) == where(y>=0, y, slope*y) for 0 < slope < 1
    o_ref[...] = jnp.maximum(y, NEG_SLOPE * y)


def _cdiv(a, b):
    return -(-a // b)


def _round_up(a, b):
    return _cdiv(a, b) * b


def _vmem_params():
    """Generation-aware (target_tile_bytes, vmem_limit_bytes)."""
    phys = 64 * 1024 * 1024                # conservative default (v7x per-TC)
    try:
        phys = int(pltpu.get_tpu_info().vmem_capacity_bytes)
    except Exception:
        pass
    # Leave ~25% headroom for compiler scratch; never ask for more than 96 MiB.
    vmem_limit = min((phys * 3) // 4, 96 * 1024 * 1024)
    # Budget ~6 tiles live at once (2x in, 2x out, 2x small m), cap at 8 MiB.
    target_tile = min(8 * 1024 * 1024, vmem_limit // 8)
    return target_tile, vmem_limit


def combine(x, m):
    """
    x: (N, C, H, W)
    m: (N, 2*C)
    returns leaky_relu(x * m1 + m2) with m1, m2 = m.chunk(2, dim=1)
            broadcast over the spatial dims (matches the torch module).
    """
    N, C, H, W = x.shape
    assert m.shape == (N, 2 * C)
    R = N * C
    L = H * W

    x2d = x.reshape(R, L)
    # Merge m1/m2 into one tiny (R, 2) stream: col 0 = scale, col 1 = shift.
    m12 = jnp.stack([m[:, :C].reshape(R), m[:, C:].reshape(R)], axis=-1).astype(x.dtype)

    target_tile_bytes, vmem_limit_bytes = _vmem_params()
    esz = jnp.dtype(x.dtype).itemsize
    L_pad = _round_up(L, 128)              # sizing only (VMEM lane padding)

    if 8 * L_pad * esz > target_tile_bytes:
        # One 8-row full-width tile already exceeds the target: chunk the lane
        # axis in multiples of 128 (ragged tail handled by Pallas).
        tr = 8
        tl = max(128, (target_tile_bytes // (8 * esz)) // 128 * 128)
        tl = min(tl, L_pad)
    else:
        # Full spatial extent per tile (block last dim == full dim is allowed
        # even when L % 128 != 0); grow the row tile toward the target.
        tl = L
        tr = max(8, (target_tile_bytes // (L_pad * esz)) // 8 * 8)
        tr = min(tr, _round_up(R, 8))

    # Keep >= 8 grid steps so megacore sharding and double-buffering stay
    # effective after tile enlargement (only shrinks tr for small problems).
    while _cdiv(R, tr) * _cdiv(L, tl) < 8 and tr > 8:
        tr = max(8, _round_up(tr // 2, 8))

    grid = (_cdiv(R, tr), _cdiv(L, tl))

    out2d = pl.pallas_call(
        combine_kernel,
        out_shape=jax.ShapeDtypeStruct((R, L), x.dtype),
        grid_spec=pltpu.PrefetchScalarGridSpec(
            num_scalar_prefetch=0,
            grid=grid,
            in_specs=[
                # x: one (tr, tl) tile per grid step (auto double-buffered,
                # ragged boundary blocks read padded / write masked).
                pl.BlockSpec((tr, tl), lambda i, j: (i, j)),
                # m12: small per-row-tile block, independent of the lane axis.
                pl.BlockSpec((tr, 2), lambda i, j: (i, 0)),
            ],
            out_specs=pl.BlockSpec((tr, tl), lambda i, j: (i, j)),
        ),
        compiler_params=pltpu.CompilerParams(
            dimension_semantics=("parallel", "parallel"),
            vmem_limit_bytes=vmem_limit_bytes,
        ),
        # TODO(synk): if the caller can donate x, add input_output_aliases={0: 0}
        # to reuse its HBM buffer for the output.
    )(x2d, m12)

    return out2d.reshape(N, C, H, W)


def combine_ref(x, m):
    N, C, H, W = x.shape
    m1 = m[:, :C].reshape(N, C, 1, 1)
    m2 = m[:, C:].reshape(N, C, 1, 1)
    y = x * m1 + m2
    return jnp.where(y >= 0, y, NEG_SLOPE * y)


if __name__ == "__main__":
    key = jax.random.PRNGKey(0)
    kx, km = jax.random.split(key)
    N, C, H, W = 2, 4, 16, 16
    x = jax.random.normal(kx, (N, C, H, W), dtype=jnp.float32)
    m = jax.random.normal(km, (N, 2 * C), dtype=jnp.float32)

    out = jax.block_until_ready(combine(x, m))

    ref = combine_ref(x, m)
    assert out.shape == (N, C, H, W)
    assert jnp.allclose(out, ref, atol=1e-6, rtol=1e-6), "mismatch vs reference"
    print("KERNEL_OK")
</pallas_src>

<mosaic_0001>
module attributes {stable_mosaic.version = 11 : i64} {
  func.func @combine_kernel(%arg0: i32, %arg1: i32, %arg2: memref<8x256xf32, #tpu.memory_space<vmem>>, %arg3: memref<8x2xf32, #tpu.memory_space<vmem>>, %arg4: memref<8x256xf32, #tpu.memory_space<vmem>>) attributes {dimension_semantics = [#tpu.dimension_semantics<parallel>, #tpu.dimension_semantics<parallel>], iteration_bounds = array<i64: 1, 1>, scalar_prefetch = 0 : i64, scratch_operands = 0 : i64, tpu.core_type = #tpu.core_type<tc>, window_params = [{transform_indices = @transform_0, window_bounds = array<i64: 8, 256>}, {transform_indices = @transform_1, window_bounds = array<i64: 8, 2>}, {transform_indices = @transform_2, window_bounds = array<i64: 8, 256>}]} {
    %c0 = arith.constant 0 : index
    %c0_0 = arith.constant 0 : index
    %0 = vector.load %arg3[%c0, %c0_0] : memref<8x2xf32, #tpu.memory_space<vmem>>, vector<8x1xf32>
    %c0_1 = arith.constant 0 : index
    %c1 = arith.constant 1 : index
    %1 = vector.load %arg3[%c0_1, %c1] : memref<8x2xf32, #tpu.memory_space<vmem>>, vector<8x1xf32>
    %c0_2 = arith.constant 0 : index
    %c0_3 = arith.constant 0 : index
    %2 = vector.load %arg2[%c0_2, %c0_3] : memref<8x256xf32, #tpu.memory_space<vmem>>, vector<8x256xf32>
    %3 = vector.broadcast %0 : vector<8x1xf32> to vector<8x256xf32>
    %4 = arith.mulf %2, %3 : vector<8x256xf32>
    %5 = vector.broadcast %1 : vector<8x1xf32> to vector<8x256xf32>
    %6 = arith.addf %4, %5 : vector<8x256xf32>
    %cst = arith.constant 0.00999999977 : f32
    %7 = vector.broadcast %cst : f32 to vector<8x256xf32>
    %8 = arith.mulf %7, %6 : vector<8x256xf32>
    %9 = arith.maximumf %6, %8 : vector<8x256xf32>
    %c0_4 = arith.constant 0 : index
    %c0_5 = arith.constant 0 : index
    %10 = vector.load %arg4[%c0_4, %c0_5] : memref<8x256xf32, #tpu.memory_space<vmem>>, vector<8x256xf32>
    tpu.vector_store %arg4[%c0_4, %c0_5], %9 {strides = array<i32>} : memref<8x256xf32, #tpu.memory_space<vmem>>, vector<8x256xf32>,
    return
  }
  func.func @transform_0(%arg0: i32, %arg1: i32) -> (i32, i32) {
    %c0_i32 = arith.constant 0 : i32
    return %arg0, %arg1 : i32, i32
  }
  func.func @transform_1(%arg0: i32, %arg1: i32) -> (i32, i32) {
    %c0_i32 = arith.constant 0 : i32
    %c0_i32_0 = arith.constant 0 : i32
    return %arg0, %c0_i32 : i32, i32
  }
  func.func @transform_2(%arg0: i32, %arg1: i32) -> (i32, i32) {
    %c0_i32 = arith.constant 0 : i32
    return %arg0, %arg1 : i32, i32
  }
}

</mosaic_0001>

<bundles_post_ra>
// kernel: tpu_custom_call.1
= control target key start
LH: loop header
LB: loop body
LE: loop exit
PB: predicated region body
PF: predicated region fallthrough
CT: control target
= control target key end

     0   :  { %7 = vsyncpa [#allocation3], 0  ;;  %s161_s0 = inlined_call_operand.hbm [shape: f32[8,256], index: 0, kind: input, shape index: {}]   ;;  %s162_s1 = inlined_call_operand.vmem [shape: f32[8,2], index: 1, kind: input, shape index: {}]   ;;  %s163_s2 = inlined_call_operand.hbm [shape: f32[8,256], index: 2, kind: output, shape index: {}]  }
   0x1   :  { %8 = vsyncpa [#allocation4], 0  ;;  %s115_s9 = smov [#allocation2]   ;;  %s67_s13 = scalar_lea.hbm %s161_s0, 256 }
   0x2   :  { %s15_s10 = sshll.u32 %s115_s9, 4  ;;  %p68_p0 = scmp.ne.s32.totalorder %s161_s0, %s67_s13  ;;  %s16_s10 = int_to_ptr.vmem [resolvable:$true] %s15_s10 }
   0x3   :  { %p71_p1 = scmp.lt.u32.totalorder %s67_s13, %s161_s0 }
   0x5   :  { %p73_p2 = pnand %p71_p1, %p68_p0 }
   0x7   :  { %76 = shalt.err (!%p73_p2)
}
   0x8   :  { %s77_s18 = scalar_lea.vmem %s16_s10, 256  ;;  %p82_p4 = scmp.lt.s32.totalorder %s16_s10, %s16_s10 }
   0x9   :  { %p78_p3 = scmp.ne.s32.totalorder %s16_s10, %s77_s18  ;;  %p83_p5 = scmp.lt.s32.totalorder %s77_s18, %s77_s18 }
   0xb   :  { %p84_p6 = por %p83_p5, %p82_p4 }
   0xd   :  { %p85_p7 = pnand %p84_p6, %p78_p3 }
   0xf   :  { %88 = shalt.err (!%p85_p7)
}
  0x10   :  { %18 = dma.hbm_to_vmem [thread:$0]  %s161_s0, 256, %s16_s10, [#allocation3]  }
  0x11   :  { %111 = dma.done.wait [#allocation3], 256  }
  0x12   :  { %112 = vsyncadd [#allocation3], 4294967040  ;;  %v116_v0 = vmov 0   ;;  %v24_v1 = vld [vmem:[%s162_s1] sm:$0xff]  ;;  %v117_v2 = vmov 1   ;;  %v26_v5 = vld [vmem:[#allocation2 + $0x8] sm:$0xff] }
  0x13   :  { %65 = vset.pattern.permute.xlu0 %v116_v0  ;;  %v25_v4 = vld [vmem:[#allocation2] sm:$0xff]  ;;  %s118_s0 = smov [#allocation5]  }
  0x14   :  { %29 = vperm.xlu0 %65, %v24_v1   ;;  %s52_s23 = sshll.u32 %s118_s0, 4  ;;  %s53_s23 = int_to_ptr.vmem [resolvable:$true] %s52_s23 }
  0x15   :  { %s89_s1 = scalar_lea.vmem %s53_s23, 256  ;;  %p94_p9 = scmp.lt.s32.totalorder %s53_s23, %s53_s23 }
  0x16   :  { %p90_p8 = scmp.ne.s32.totalorder %s53_s23, %s89_s1  ;;  %p95_p10 = scmp.lt.s32.totalorder %s89_s1, %s89_s1 }
  0x18   :  { %66 = vset.pattern.permute.xlu0 %v117_v2  ;;  %p96_p11 = por %p95_p10, %p94_p9 }
  0x19   :  { %35 = vperm.xlu0 %66, %v24_v1  }
  0x1a   :  { %p97_p12 = pnand %p96_p11, %p90_p8 }
  0x93   :  { %v30_v3 = vpop.permute.xlu0 %29 }
  0x94   :  { %v32_v6 = vmul.f32 %v30_v3, %v25_v4  ;;  %v33_v7 = vmul.f32 %v30_v3, %v26_v5 }
  0x98   :  { %v36_v8 = vpop.permute.xlu0 %35 }
  0x99   :  { %v38_v9 = vadd.f32 %v36_v8, %v32_v6  ;;  %v39_v10 = vadd.f32 %v36_v8, %v33_v7 }
  0x9b   :  { %v40_v11 = vmul.f32 0.01, %v38_v9  ;;  %v41_v12 = vmul.f32 0.01, %v39_v10 }
  0x9d   :  { %v42_v13 = vmax.f32 %v38_v9, %v40_v11  ;;  %v43_v14 = vmax.f32 %v39_v10, %v41_v12 }
  0x9f   :  { %44 = vst [vmem:[#allocation5] sm:$0xff] %v42_v13  ;;  %45 = vst [vmem:[#allocation5 + $0x8] sm:$0xff] %v43_v14 }
  0xa0   :  { %100 = shalt.err (!%p97_p12)
}
  0xa1   :  { %s101_s26 = scalar_lea.hbm %s163_s2, 256 }
  0xa2   :  { %p102_p13 = scmp.ne.s32.totalorder %s163_s2, %s101_s26  ;;  %p105_p0 = scmp.lt.u32.totalorder %s101_s26, %s163_s2 }
  0xa4   :  { %p107_p1 = pnand %p105_p0, %p102_p13 }
  0xa6   :  { %110 = shalt.err (!%p107_p1)
}
  0xa7   :  { %55 = dma.vmem_to_hbm [thread:$0]  %s53_s23, 256, %s163_s2, [#allocation4]  }
  0xa8   :  { %113 = dma.done.wait [#allocation4], 256  }
  0xa9   :  { %114 = vsyncadd [#allocation4], 4294967040 }
  0xaa   :  { %59 = vsyncpa [#allocation3], 1 }
  0xab   :  { %60 = vsyncpa [#allocation4], 1 }

</bundles_post_ra>
